<compile_context>
chip_gen: v7x
topology: tpu7x:2x2x1
jax: 0.10.0
libtpu: 0.0.40
codegen_flags: <defaults>
</compile_context>

<pallas_src>
import functools

import jax
import jax.numpy as jnp
from jax.experimental import pallas as pl
from jax.experimental.pallas import tpu as pltpu


def _band_weights(w, W):
    """(3,3,Cin,Cout) HWIO weights -> (3, (W+2)*Cin, W*Cout) block-banded form.

    band[kh, (w+kw)*Cin + ci, w*Cout + co] == w[kh, kw, ci, co], zero elsewhere.
    Row index runs over the W-padded pixel position, so a 'same' 3x3 conv of a
    padded row block (H, (W+2)*Cin) is just  sum_kh  rows(kh) @ band[kh].
    """
    KH, KW, Cin, Cout = w.shape
    shift = jnp.arange(KW)[:, None] + jnp.arange(W)[None, :]          # (KW, W)
    sel = jax.nn.one_hot(shift, W + 2, dtype=w.dtype)                 # (KW, W, W+2)
    band = jnp.einsum("kwp,hkio->hpiwo", sel, w)                      # (KH, W+2, Cin, W, Cout)
    return band.reshape(KH, (W + 2) * Cin, W * Cout)


def _fused_conv_kernel(Cin, F, x_ref, w1_ref, b1_ref, w2_ref, b2_ref, o_ref,
                       xp_ref, hp_ref):
    """One batch element: relu(conv2(relu(conv1(x)))), 3x3 'same' convs.

    x_ref : (1, H, W*Cin)        bf16  input rows (lane-dense, channels fastest)
    w1_ref: (3, (W+2)*Cin, W*F)  bf16  banded conv1 weights (one band per kh)
    b1_ref: (1, W*F)             f32   conv1 bias tiled across W
    w2_ref: (3, (W+2)*F, W*F)    bf16  banded conv2 weights
    b2_ref: (1, W*F)             f32   conv2 bias tiled across W
    o_ref : (1, H, W*F)          f32   output rows (lane-dense)
    xp_ref: (H+2, (W+2)*Cin)     f32   scratch: zero-padded input
    hp_ref: (H+2, (W+2)*F)       f32   scratch: zero-padded intermediate
    """
    H = o_ref.shape[1]
    WF = o_ref.shape[2]
    W = WF // F
    WCin = W * Cin

    # ---- conv1: 'same' padding done in VMEM (1-row / 1-pixel zero halo) ----
    xp_ref[...] = jnp.zeros_like(xp_ref)
    xp_ref[pl.ds(1, H), pl.ds(Cin, WCin)] = x_ref[0].astype(xp_ref.dtype)

    acc = jnp.zeros((H, WF), jnp.float32)
    for kh in range(3):  # 3 row-shifted MXU matmuls: (H,(W+2)Cin) @ ((W+2)Cin, W*F)
        acc += jax.lax.dot_general(
            xp_ref[pl.ds(kh, H), :].astype(jnp.bfloat16), w1_ref[kh],
            dimension_numbers=(((1,), (0,)), ((), ())),
            preferred_element_type=jnp.float32)
    h1 = jnp.maximum(acc + b1_ref[...], 0.0)                    # (H, W*F) f32

    # ---- conv2: intermediate never leaves VMEM ----
    hp_ref[...] = jnp.zeros_like(hp_ref)
    hp_ref[pl.ds(1, H), pl.ds(F, WF)] = h1

    acc2 = jnp.zeros((H, WF), jnp.float32)
    for kh in range(3):
        acc2 += jax.lax.dot_general(
            hp_ref[pl.ds(kh, H), :].astype(jnp.bfloat16), w2_ref[kh],
            dimension_numbers=(((1,), (0,)), ((), ())),
            preferred_element_type=jnp.float32)
    o_ref[...] = jnp.maximum(acc2 + b2_ref[...], 0.0)[None].astype(o_ref.dtype)


def conv_layers_fused_nhwc(x_nhwc, params):
    """Fused relu(conv2(relu(conv1(x)))) on NHWC input, one pallas_call."""
    N, H, W, Cin = x_nhwc.shape
    F = params["w1"].shape[-1]
    WF = W * F

    x_rows = x_nhwc.reshape(N, H, W * Cin).astype(jnp.bfloat16)   # lane-dense rows
    w1b = _band_weights(params["w1"], W).astype(jnp.bfloat16)     # (3,(W+2)Cin,WF)
    w2b = _band_weights(params["w2"], W).astype(jnp.bfloat16)     # (3,(W+2)F, WF)
    b1r = jnp.tile(params["b1"], W).reshape(1, WF).astype(jnp.float32)
    b2r = jnp.tile(params["b2"], W).reshape(1, WF).astype(jnp.float32)

    kernel = functools.partial(_fused_conv_kernel, Cin, F)
    out_rows = pl.pallas_call(
        kernel,
        out_shape=jax.ShapeDtypeStruct((N, H, WF), jnp.float32),
        grid_spec=pltpu.PrefetchScalarGridSpec(
            num_scalar_prefetch=0,
            grid=(N,),
            in_specs=[
                pl.BlockSpec((1, H, W * Cin), lambda n: (n, 0, 0)),
                pl.BlockSpec((3, (W + 2) * Cin, WF), lambda n: (0, 0, 0)),
                pl.BlockSpec((1, WF), lambda n: (0, 0)),
                pl.BlockSpec((3, (W + 2) * F, WF), lambda n: (0, 0, 0)),
                pl.BlockSpec((1, WF), lambda n: (0, 0)),
            ],
            out_specs=pl.BlockSpec((1, H, WF), lambda n: (n, 0, 0)),
            scratch_shapes=[
                pltpu.VMEM((H + 2, (W + 2) * Cin), jnp.float32),
                pltpu.VMEM((H + 2, (W + 2) * F), jnp.float32),
            ],
        ),
        compiler_params=pltpu.CompilerParams(
            dimension_semantics=("parallel",)),
    )(x_rows, w1b, b1r, w2b, b2r)

    return out_rows.reshape(N, H, W, F)


def conv_layers_forward(x_nchw, params):
    """Pallas implementation of ConvLayers.forward; NCHW in / NCHW out to match
    PyTorch.  (Keeping the surrounding model NHWC end-to-end would drop these
    two full-HBM relayout transposes.)"""
    x = jnp.transpose(x_nchw, (0, 2, 3, 1))          # NCHW -> NHWC
    out = conv_layers_fused_nhwc(x, params)
    return jnp.transpose(out, (0, 3, 1, 2))          # NHWC -> NCHW


def init_params(key, in_channels, filters):
    """Deterministic synthetic weights, stored HWIO (= PyTorch OIHW transposed)."""
    k1, k2, k3, k4 = jax.random.split(key, 4)
    bound1 = 1.0 / jnp.sqrt(in_channels * 9)
    bound2 = 1.0 / jnp.sqrt(filters * 9)
    return {
        "w1": jax.random.uniform(k1, (3, 3, in_channels, filters),
                                 jnp.float32, -bound1, bound1),
        "b1": jax.random.uniform(k2, (filters,), jnp.float32, -bound1, bound1),
        "w2": jax.random.uniform(k3, (3, 3, filters, filters),
                                 jnp.float32, -bound2, bound2),
        "b2": jax.random.uniform(k4, (filters,), jnp.float32, -bound2, bound2),
    }


def _reference_forward(x_nchw, params):
    """Pure-JAX reference (lax.conv), mirroring the kernel's bf16 MXU inputs
    with f32 accumulation so the comparison is apples-to-apples."""
    def conv(x, w, b):
        y = jax.lax.conv_general_dilated(
            x.astype(jnp.bfloat16), w.astype(jnp.bfloat16),
            window_strides=(1, 1), padding="SAME",
            dimension_numbers=("NCHW", "HWIO", "NCHW"),
            preferred_element_type=jnp.float32)
        return jax.nn.relu(y + b.reshape(1, -1, 1, 1))
    out = conv(x_nchw, params["w1"], params["b1"])
    out = conv(out, params["w2"], params["b2"])
    return out


if __name__ == "__main__":
    key = jax.random.PRNGKey(0)
    kx, kp = jax.random.split(key)

    N, C_in, H, W = 2, 4, 16, 16
    filters = 8     # W * filters = 128 -> fully lane-dense output rows

    x = jax.random.normal(kx, (N, C_in, H, W), dtype=jnp.float32)
    params = init_params(kp, C_in, filters)

    out = jax.jit(conv_layers_forward)(x, params)
    out = jax.block_until_ready(out)

    ref = _reference_forward(x, params)
    assert out.shape == (N, filters, H, W)
    max_err = jnp.max(jnp.abs(out - ref))
    assert jnp.allclose(out, ref, atol=2e-2, rtol=2e-2), f"max err {max_err}"

    print("KERNEL_OK")
</pallas_src>

<mosaic_0001>
module attributes {stable_mosaic.version = 11 : i64} {
  func.func @_fused_conv_kernel(%arg0: i32, %arg1: memref<1x16x64xbf16, #tpu.memory_space<vmem>>, %arg2: memref<3x72x128xbf16, #tpu.memory_space<vmem>>, %arg3: memref<1x128xf32, #tpu.memory_space<vmem>>, %arg4: memref<3x144x128xbf16, #tpu.memory_space<vmem>>, %arg5: memref<1x128xf32, #tpu.memory_space<vmem>>, %arg6: memref<1x16x128xf32, #tpu.memory_space<vmem>>, %arg7: memref<18x72xf32, #tpu.memory_space<vmem>>, %arg8: memref<18x144xf32, #tpu.memory_space<vmem>>) attributes {dimension_semantics = [#tpu.dimension_semantics<parallel>], iteration_bounds = array<i64: 2>, scalar_prefetch = 0 : i64, scratch_operands = 2 : i64, tpu.core_type = #tpu.core_type<tc>, window_params = [{transform_indices = @transform_0, window_bounds = array<i64: 1, 16, 64>}, {pipeline_mode = #tpu.pipeline_mode<synchronous>, transform_indices = @transform_1, window_bounds = array<i64: 3, 72, 128>}, {pipeline_mode = #tpu.pipeline_mode<synchronous>, transform_indices = @transform_2, window_bounds = array<i64: 1, 128>}, {pipeline_mode = #tpu.pipeline_mode<synchronous>, transform_indices = @transform_3, window_bounds = array<i64: 3, 144, 128>}, {pipeline_mode = #tpu.pipeline_mode<synchronous>, transform_indices = @transform_4, window_bounds = array<i64: 1, 128>}, {transform_indices = @transform_5, window_bounds = array<i64: 1, 16, 128>}]} {
    %cst = arith.constant 0.000000e+00 : f32
    %0 = vector.broadcast %cst : f32 to vector<18x72xf32>
    %c0 = arith.constant 0 : index
    %c0_0 = arith.constant 0 : index
    %1 = vector.load %arg7[%c0, %c0_0] : memref<18x72xf32, #tpu.memory_space<vmem>>, vector<18x72xf32>
    tpu.vector_store %arg7[%c0, %c0_0], %0 {strides = array<i32>} : memref<18x72xf32, #tpu.memory_space<vmem>>, vector<18x72xf32>,
    %c0_1 = arith.constant 0 : index
    %c0_2 = arith.constant 0 : index
    %c0_3 = arith.constant 0 : index
    %2 = vector.load %arg1[%c0_1, %c0_2, %c0_3] : memref<1x16x64xbf16, #tpu.memory_space<vmem>>, vector<1x16x64xbf16>
    %3 = vector.shape_cast %2 : vector<1x16x64xbf16> to vector<16x64xbf16>
    %4 = arith.extf %3 : vector<16x64xbf16> to vector<16x64xf32>
    %c1 = arith.constant 1 : index
    %c4 = arith.constant 4 : index
    %5 = vector.load %arg7[%c1, %c4] : memref<18x72xf32, #tpu.memory_space<vmem>>, vector<16x64xf32>
    tpu.vector_store %arg7[%c1, %c4], %4 {strides = array<i32>} : memref<18x72xf32, #tpu.memory_space<vmem>>, vector<16x64xf32>,
    %cst_4 = arith.constant 0.000000e+00 : f32
    %6 = vector.broadcast %cst_4 : f32 to vector<16x128xf32>
    %c0_5 = arith.constant 0 : index
    %c0_6 = arith.constant 0 : index
    %7 = vector.load %arg7[%c0_5, %c0_6] : memref<18x72xf32, #tpu.memory_space<vmem>>, vector<16x72xf32>
    %8 = arith.truncf %7 : vector<16x72xf32> to vector<16x72xbf16>
    %c0_7 = arith.constant 0 : index
    %c0_8 = arith.constant 0 : index
    %c0_9 = arith.constant 0 : index
    %9 = vector.load %arg2[%c0_7, %c0_8, %c0_9] : memref<3x72x128xbf16, #tpu.memory_space<vmem>>, vector<1x72x128xbf16>
    %10 = vector.shape_cast %9 : vector<1x72x128xbf16> to vector<72x128xbf16>
    %cst_10 = arith.constant dense<0.000000e+00> : vector<16x128xf32>
    %11 = tpu.matmul %8, %10, %cst_10 {dimension_numbers = #tpu.dot_dimension_numbers<[1], [0], [0], [1], [0, 0, 1, 1], [], []>} : vector<16x72xbf16>, vector<72x128xbf16>, vector<16x128xf32> -> vector<16x128xf32>
    %12 = arith.addf %6, %11 : vector<16x128xf32>
    %c1_11 = arith.constant 1 : index
    %c0_12 = arith.constant 0 : index
    %13 = vector.load %arg7[%c1_11, %c0_12] : memref<18x72xf32, #tpu.memory_space<vmem>>, vector<16x72xf32>
    %14 = arith.truncf %13 : vector<16x72xf32> to vector<16x72xbf16>
    %c1_13 = arith.constant 1 : index
    %c0_14 = arith.constant 0 : index
    %c0_15 = arith.constant 0 : index
    %15 = vector.load %arg2[%c1_13, %c0_14, %c0_15] : memref<3x72x128xbf16, #tpu.memory_space<vmem>>, vector<1x72x128xbf16>
    %16 = vector.shape_cast %15 : vector<1x72x128xbf16> to vector<72x128xbf16>
    %cst_16 = arith.constant dense<0.000000e+00> : vector<16x128xf32>
    %17 = tpu.matmul %14, %16, %cst_16 {dimension_numbers = #tpu.dot_dimension_numbers<[1], [0], [0], [1], [0, 0, 1, 1], [], []>} : vector<16x72xbf16>, vector<72x128xbf16>, vector<16x128xf32> -> vector<16x128xf32>
    %18 = arith.addf %12, %17 : vector<16x128xf32>
    %c2 = arith.constant 2 : index
    %c0_17 = arith.constant 0 : index
    %19 = vector.load %arg7[%c2, %c0_17] : memref<18x72xf32, #tpu.memory_space<vmem>>, vector<16x72xf32>
    %20 = arith.truncf %19 : vector<16x72xf32> to vector<16x72xbf16>
    %c2_18 = arith.constant 2 : index
    %c0_19 = arith.constant 0 : index
    %c0_20 = arith.constant 0 : index
    %21 = vector.load %arg2[%c2_18, %c0_19, %c0_20] : memref<3x72x128xbf16, #tpu.memory_space<vmem>>, vector<1x72x128xbf16>
    %22 = vector.shape_cast %21 : vector<1x72x128xbf16> to vector<72x128xbf16>
    %cst_21 = arith.constant dense<0.000000e+00> : vector<16x128xf32>
    %23 = tpu.matmul %20, %22, %cst_21 {dimension_numbers = #tpu.dot_dimension_numbers<[1], [0], [0], [1], [0, 0, 1, 1], [], []>} : vector<16x72xbf16>, vector<72x128xbf16>, vector<16x128xf32> -> vector<16x128xf32>
    %24 = arith.addf %18, %23 : vector<16x128xf32>
    %c0_22 = arith.constant 0 : index
    %c0_23 = arith.constant 0 : index
    %25 = vector.load %arg3[%c0_22, %c0_23] : memref<1x128xf32, #tpu.memory_space<vmem>>, vector<1x128xf32>
    %26 = vector.broadcast %25 : vector<1x128xf32> to vector<16x128xf32>
    %27 = arith.addf %24, %26 : vector<16x128xf32>
    %cst_24 = arith.constant 0.000000e+00 : f32
    %28 = vector.broadcast %cst_24 : f32 to vector<16x128xf32>
    %29 = arith.maximumf %27, %28 : vector<16x128xf32>
    %cst_25 = arith.constant 0.000000e+00 : f32
    %30 = vector.broadcast %cst_25 : f32 to vector<18x144xf32>
    %c0_26 = arith.constant 0 : index
    %c0_27 = arith.constant 0 : index
    %31 = vector.load %arg8[%c0_26, %c0_27] : memref<18x144xf32, #tpu.memory_space<vmem>>, vector<18x144xf32>
    tpu.vector_store %arg8[%c0_26, %c0_27], %30 {strides = array<i32>} : memref<18x144xf32, #tpu.memory_space<vmem>>, vector<18x144xf32>,
    %c1_28 = arith.constant 1 : index
    %c8 = arith.constant 8 : index
    %32 = vector.load %arg8[%c1_28, %c8] : memref<18x144xf32, #tpu.memory_space<vmem>>, vector<16x128xf32>
    tpu.vector_store %arg8[%c1_28, %c8], %29 {strides = array<i32>} : memref<18x144xf32, #tpu.memory_space<vmem>>, vector<16x128xf32>,
    %cst_29 = arith.constant 0.000000e+00 : f32
    %33 = vector.broadcast %cst_29 : f32 to vector<16x128xf32>
    %c0_30 = arith.constant 0 : index
    %c0_31 = arith.constant 0 : index
    %34 = vector.load %arg8[%c0_30, %c0_31] : memref<18x144xf32, #tpu.memory_space<vmem>>, vector<16x144xf32>
    %35 = arith.truncf %34 : vector<16x144xf32> to vector<16x144xbf16>
    %c0_32 = arith.constant 0 : index
    %c0_33 = arith.constant 0 : index
    %c0_34 = arith.constant 0 : index
    %36 = vector.load %arg4[%c0_32, %c0_33, %c0_34] : memref<3x144x128xbf16, #tpu.memory_space<vmem>>, vector<1x144x128xbf16>
    %37 = vector.shape_cast %36 : vector<1x144x128xbf16> to vector<144x128xbf16>
    %cst_35 = arith.constant dense<0.000000e+00> : vector<16x128xf32>
    %38 = tpu.matmul %35, %37, %cst_35 {dimension_numbers = #tpu.dot_dimension_numbers<[1], [0], [0], [1], [0, 0, 1, 1], [], []>} : vector<16x144xbf16>, vector<144x128xbf16>, vector<16x128xf32> -> vector<16x128xf32>
    %39 = arith.addf %33, %38 : vector<16x128xf32>
    %c1_36 = arith.constant 1 : index
    %c0_37 = arith.constant 0 : index
    %40 = vector.load %arg8[%c1_36, %c0_37] : memref<18x144xf32, #tpu.memory_space<vmem>>, vector<16x144xf32>
    %41 = arith.truncf %40 : vector<16x144xf32> to vector<16x144xbf16>
    %c1_38 = arith.constant 1 : index
    %c0_39 = arith.constant 0 : index
    %c0_40 = arith.constant 0 : index
    %42 = vector.load %arg4[%c1_38, %c0_39, %c0_40] : memref<3x144x128xbf16, #tpu.memory_space<vmem>>, vector<1x144x128xbf16>
    %43 = vector.shape_cast %42 : vector<1x144x128xbf16> to vector<144x128xbf16>
    %cst_41 = arith.constant dense<0.000000e+00> : vector<16x128xf32>
    %44 = tpu.matmul %41, %43, %cst_41 {dimension_numbers = #tpu.dot_dimension_numbers<[1], [0], [0], [1], [0, 0, 1, 1], [], []>} : vector<16x144xbf16>, vector<144x128xbf16>, vector<16x128xf32> -> vector<16x128xf32>
    %45 = arith.addf %39, %44 : vector<16x128xf32>
    %c2_42 = arith.constant 2 : index
    %c0_43 = arith.constant 0 : index
    %46 = vector.load %arg8[%c2_42, %c0_43] : memref<18x144xf32, #tpu.memory_space<vmem>>, vector<16x144xf32>
    %47 = arith.truncf %46 : vector<16x144xf32> to vector<16x144xbf16>
    %c2_44 = arith.constant 2 : index
    %c0_45 = arith.constant 0 : index
    %c0_46 = arith.constant 0 : index
    %48 = vector.load %arg4[%c2_44, %c0_45, %c0_46] : memref<3x144x128xbf16, #tpu.memory_space<vmem>>, vector<1x144x128xbf16>
    %49 = vector.shape_cast %48 : vector<1x144x128xbf16> to vector<144x128xbf16>
    %cst_47 = arith.constant dense<0.000000e+00> : vector<16x128xf32>
    %50 = tpu.matmul %47, %49, %cst_47 {dimension_numbers = #tpu.dot_dimension_numbers<[1], [0], [0], [1], [0, 0, 1, 1], [], []>} : vector<16x144xbf16>, vector<144x128xbf16>, vector<16x128xf32> -> vector<16x128xf32>
    %51 = arith.addf %45, %50 : vector<16x128xf32>
    %c0_48 = arith.constant 0 : index
    %c0_49 = arith.constant 0 : index
    %52 = vector.load %arg5[%c0_48, %c0_49] : memref<1x128xf32, #tpu.memory_space<vmem>>, vector<1x128xf32>
    %53 = vector.broadcast %52 : vector<1x128xf32> to vector<16x128xf32>
    %54 = arith.addf %51, %53 : vector<16x128xf32>
    %cst_50 = arith.constant 0.000000e+00 : f32
    %55 = vector.broadcast %cst_50 : f32 to vector<16x128xf32>
    %56 = arith.maximumf %54, %55 : vector<16x128xf32>
    %57 = vector.shape_cast %56 : vector<16x128xf32> to vector<1x16x128xf32>
    %c0_51 = arith.constant 0 : index
    %c0_52 = arith.constant 0 : index
    %c0_53 = arith.constant 0 : index
    %58 = vector.load %arg6[%c0_51, %c0_52, %c0_53] : memref<1x16x128xf32, #tpu.memory_space<vmem>>, vector<1x16x128xf32>
    tpu.vector_store %arg6[%c0_51, %c0_52, %c0_53], %57 {strides = array<i32>} : memref<1x16x128xf32, #tpu.memory_space<vmem>>, vector<1x16x128xf32>,
    return
  }
  func.func @transform_0(%arg0: i32) -> (i32, i32, i32) {
    %c0_i32 = arith.constant 0 : i32
    %c0_i32_0 = arith.constant 0 : i32
    %c0_i32_1 = arith.constant 0 : i32
    return %arg0, %c0_i32, %c0_i32_0 : i32, i32, i32
  }
  func.func @transform_1(%arg0: i32) -> (i32, i32, i32) {
    %c0_i32 = arith.constant 0 : i32
    %c0_i32_0 = arith.constant 0 : i32
    %c0_i32_1 = arith.constant 0 : i32
    %c0_i32_2 = arith.constant 0 : i32
    return %c0_i32, %c0_i32_0, %c0_i32_1 : i32, i32, i32
  }
  func.func @transform_2(%arg0: i32) -> (i32, i32) {
    %c0_i32 = arith.constant 0 : i32
    %c0_i32_0 = arith.constant 0 : i32
    %c0_i32_1 = arith.constant 0 : i32
    return %c0_i32, %c0_i32_0 : i32, i32
  }
  func.func @transform_3(%arg0: i32) -> (i32, i32, i32) {
    %c0_i32 = arith.constant 0 : i32
    %c0_i32_0 = arith.constant 0 : i32
    %c0_i32_1 = arith.constant 0 : i32
    %c0_i32_2 = arith.constant 0 : i32
    return %c0_i32, %c0_i32_0, %c0_i32_1 : i32, i32, i32
  }
  func.func @transform_4(%arg0: i32) -> (i32, i32) {
    %c0_i32 = arith.constant 0 : i32
    %c0_i32_0 = arith.constant 0 : i32
    %c0_i32_1 = arith.constant 0 : i32
    return %c0_i32, %c0_i32_0 : i32, i32
  }
  func.func @transform_5(%arg0: i32) -> (i32, i32, i32) {
    %c0_i32 = arith.constant 0 : i32
    %c0_i32_0 = arith.constant 0 : i32
    %c0_i32_1 = arith.constant 0 : i32
    return %arg0, %c0_i32, %c0_i32_0 : i32, i32, i32
  }
}

</mosaic_0001>

<bundles_post_ra>
// kernel: tile.13
= control target key start
LH: loop header
LB: loop body
LE: loop exit
PB: predicated region body
PF: predicated region fallthrough
CT: control target
= control target key end

     0   :  { %s28_s0 = inlined_call_operand.vmem [shape: f32[8], index: 0, kind: input, shape index: {}]   ;;  %s29_s1 = inlined_call_operand.vmem [shape: f32[16,8], index: 1, kind: output, shape index: {}]  }
   0x1   :  { %v4_v0 = vld [vmem:[%s28_s0] ss:$0 sm:$0xff] }
   0x2   :  { %5 = vst [vmem:[%s29_s1] sm:$0xff] %v4_v0  ;;  %8 = vst [vmem:[%s29_s1 + $0x8] sm:$0xff] %v4_v0 }

// kernel: tile.14
= control target key start
LH: loop header
LB: loop body
LE: loop exit
PB: predicated region body
PF: predicated region fallthrough
CT: control target
= control target key end

     0   :  { %s131_s10 = smov 120   ;;  %s132_s11 = smov 104   ;;  %vm3_vm0 = vcmask 64512   ;;  %vm9_vm1 = vcmask 1048512   ;;  %vm15_vm2 = vcmask 982912   ;;  %vm21_vm3 = vcmask 917312   ;;  %s207_s0 = inlined_call_operand.vmem [shape: f32[16,8], index: 0, kind: input, shape index: {}]   ;;  %s208_s1 = inlined_call_operand.vmem [shape: f32[1,128], index: 1, kind: output, shape index: {}]  }
   0x1   :  { %v101_v0 = vld [vmem:[%s207_s0 + $0xf] sm:$0x1]   ;;  %v103_v1 = vld [vmem:[%s207_s0 + $0xd] sm:$0x1]   ;;  %v102_v2 = vld [vmem:[%s207_s0 + $0xe] sm:$0x1]  }
   0x2   :  { %7 = vrot.lane.b32.xlu0 %v101_v0, %s131_s10  ;;  %19 = vrot.lane.b32.xlu1 %v103_v1, %s132_s11  ;;  %v104_v3 = vld [vmem:[%s207_s0 + $0xc] sm:$0x1]   ;;  %s133_s16 = smov 112   ;;  %s134_s17 = smov 96   ;;  %v105_v4 = vld [vmem:[%s207_s0 + $0xb] sm:$0x1]  }
   0x3   :  { %v106_v5 = vld [vmem:[%s207_s0 + $0xa] sm:$0x1]   ;;  %v2_v6 = vld [vmem:[%s207_s0] sm:$0x1]   ;;  %s135_s24 = smov 88   ;;  %s136_s25 = smov 80  }
   0x4   :  { %4 = vst.msk [vmem:[#allocation0] sm:$0x1] %vm3_vm0, %v2_v6   ;;  %v107_v7 = vld [vmem:[%s207_s0 + $0x9] sm:$0x1]   ;;  %v108_v8 = vld [vmem:[%s207_s0 + $0x8] sm:$0x1]  }
   0x5   :  { %s137_s30 = smov 72   ;;  %s138_s2 = smov 64   ;;  %v109_v9 = vld [vmem:[%s207_s0 + $0x7] sm:$0x1]   ;;  %v110_v10 = vld [vmem:[%s207_s0 + $0x6] sm:$0x1]  }
   0x6   :  { %13 = vrot.lane.b32.xlu0 %v102_v2, %s133_s16  ;;  %25 = vrot.lane.b32.xlu1 %v104_v3, %s134_s17  ;;  %s139_s7 = smov 56   ;;  %s140_s8 = smov 48   ;;  %v111_v11 = vld [vmem:[%s207_s0 + $0x5] sm:$0x1]   ;;  %v112_v12 = vld [vmem:[%s207_s0 + $0x4] sm:$0x1]  }
   0x7   :  { %s141_s13 = smov 40   ;;  %s142_s14 = smov 32   ;;  %v113_v13 = vld [vmem:[%s207_s0 + $0x3] sm:$0x1]   ;;  %v114_v14 = vld [vmem:[%s207_s0 + $0x2] sm:$0x1]  }
   0x8   :  { %s143_s19 = smov 24   ;;  %s144_s20 = smov 16   ;;  %v115_v15 = vld [vmem:[%s207_s0 + $0x1] sm:$0x1]   ;;  %vm27_vm4 = vcmask 851712   ;;  %vm33_vm5 = vcmask 786112  }
   0x9   :  { %s145_s0 = smov 8   ;;  %vm39_vm6 = vcmask 720512   ;;  %vm45_vm7 = vcmask 654912   ;;  %vm51_vm8 = vcmask 589312   ;;  %vm57_vm9 = vcmask 523712  }
   0xa   :  { %31 = vrot.lane.b32.xlu0 %v105_v4, %s135_s24  ;;  %37 = vrot.lane.b32.xlu1 %v106_v5, %s136_s25  ;;  %vm63_vm10 = vcmask 458112   ;;  %vm69_vm11 = vcmask 392512   ;;  %vm75_vm12 = vcmask 326912   ;;  %vm81_vm13 = vcmask 261312  }
   0xb   :  { %vm87_vm14 = vcmask 195712   ;;  %vm93_vm15 = vcmask 130112  }
   0xe   :  { %43 = vrot.lane.b32.xlu0 %v107_v7, %s137_s30  ;;  %49 = vrot.lane.b32.xlu1 %v108_v8, %s138_s2 }
  0x12   :  { %55 = vrot.lane.b32.xlu0 %v109_v9, %s139_s7  ;;  %61 = vrot.lane.b32.xlu1 %v110_v10, %s140_s8 }
  0x16   :  { %67 = vrot.lane.b32.xlu0 %v111_v11, %s141_s13  ;;  %73 = vrot.lane.b32.xlu1 %v112_v12, %s142_s14 }
  0x1a   :  { %79 = vrot.lane.b32.xlu0 %v113_v13, %s143_s19  ;;  %85 = vrot.lane.b32.xlu1 %v114_v14, %s144_s20 }
  0x1e   :  { %91 = vrot.lane.b32.xlu0 %v115_v15, %s145_s0 }
  0x74   :  { %v8_v16 = vpop.permute.xlu0 %7   ;;  %v20_v17 = vpop.permute.xlu1 %19  }
  0x75   :  { %10 = vst.msk [vmem:[#allocation0] sm:$0x1] %vm9_vm1, %v8_v16  }
  0x78   :  { %v14_v18 = vpop.permute.xlu0 %13   ;;  %v26_v19 = vpop.permute.xlu1 %25  }
  0x79   :  { %16 = vst.msk [vmem:[#allocation0] sm:$0x1] %vm15_vm2, %v14_v18  }
  0x7a   :  { %22 = vst.msk [vmem:[#allocation0] sm:$0x1] %vm21_vm3, %v20_v17  }
  0x7b   :  { %28 = vst.msk [vmem:[#allocation0] sm:$0x1] %vm27_vm4, %v26_v19  }
  0x7c   :  { %v32_v20 = vpop.permute.xlu0 %31   ;;  %v38_v21 = vpop.permute.xlu1 %37  }
  0x7d   :  { %34 = vst.msk [vmem:[#allocation0] sm:$0x1] %vm33_vm5, %v32_v20  }
  0x7e   :  { %40 = vst.msk [vmem:[#allocation0] sm:$0x1] %vm39_vm6, %v38_v21  }
  0x80   :  { %v44_v22 = vpop.permute.xlu0 %43   ;;  %v50_v23 = vpop.permute.xlu1 %49  }
  0x81   :  { %46 = vst.msk [vmem:[#allocation0] sm:$0x1] %vm45_vm7, %v44_v22  }
  0x82   :  { %52 = vst.msk [vmem:[#allocation0] sm:$0x1] %vm51_vm8, %v50_v23  }
  0x84   :  { %v56_v24 = vpop.permute.xlu0 %55   ;;  %v62_v25 = vpop.permute.xlu1 %61  }
  0x85   :  { %58 = vst.msk [vmem:[#allocation0] sm:$0x1] %vm57_vm9, %v56_v24  }
  0x86   :  { %64 = vst.msk [vmem:[#allocation0] sm:$0x1] %vm63_vm10, %v62_v25  }
  0x88   :  { %v68_v26 = vpop.permute.xlu0 %67   ;;  %v74_v27 = vpop.permute.xlu1 %73  }
  0x89   :  { %70 = vst.msk [vmem:[#allocation0] sm:$0x1] %vm69_vm11, %v68_v26  }
  0x8a   :  { %76 = vst.msk [vmem:[#allocation0] sm:$0x1] %vm75_vm12, %v74_v27  }
  0x8c   :  { %v80_v28 = vpop.permute.xlu0 %79   ;;  %v86_v29 = vpop.permute.xlu1 %85  }
  0x8d   :  { %82 = vst.msk [vmem:[#allocation0] sm:$0x1] %vm81_vm13, %v80_v28  }
  0x8e   :  { %88 = vst.msk [vmem:[#allocation0] sm:$0x1] %vm87_vm14, %v86_v29  }
  0x90   :  { %v92_v30 = vpop.permute.xlu0 %91  }
  0x91   :  { %94 = vst.msk [vmem:[#allocation0] sm:$0x1] %vm93_vm15, %v92_v30  }
  0x98   :  { %v98_v31 = vld [vmem:[#allocation0] sm:$0x1] }
  0x99   :  { %100 = vst [vmem:[%s208_s1] sm:$0x1] %v98_v31 }

// kernel: conv_layers_forward.1
= control target key start
LH: loop header
LB: loop body
LE: loop exit
PB: predicated region body
PF: predicated region fallthrough
CT: control target
= control target key end

     0   :  { %s1319_s18 = smov 0   ;;  %s1549_s0 = inlined_call_operand.vmem [shape: bf16[2,16,64], index: 0, kind: input, shape index: {}]   ;;  %s1550_s1 = inlined_call_operand.vmem [shape: bf16[3,72,128], index: 1, kind: input, shape index: {}]   ;;  %s1551_s2 = inlined_call_operand.vmem [shape: f32[1,128], index: 2, kind: input, shape index: {}]   ;;  %s1552_s3 = inlined_call_operand.vmem [shape: bf16[3,144,128], index: 3, kind: input, shape index: {}]   ;;  %s1553_s4 = inlined_call_operand.vmem [shape: f32[1,128], index: 4, kind: input, shape index: {}]   ;;  %s1554_s5 = inlined_call_operand.vmem [shape: f32[2,16,128], index: 5, kind: output, shape index: {}]  }
   0x1 LB: > { %s1035_s19 = sadd.s32 4294967295, %s1282_s18   ;;  %p1039_p0 = scmp.ge.s32.totalorder %s1282_s18, 1  ;;  %s1282_s18 = sphi %s1319_s18, %s15_s18  }
   0x2   : > { %p187_p1 = scmp.lt.s32.totalorder %s1282_s18, 3 }
   0x4   : > { %p188_p2 = pnand %p1039_p0, %p187_p1 }
   0x5   : > { %p215_p3 = scmp.lt.s32.totalorder (!%p188_p2), %s1035_s19, 1  ;;  %v1234_v0 = vld [vmem:[%s1550_s1 + $0x24] sm:$0xff] (!%p188_p2)   ;;  %v1284_v1 = vmov (!%p188_p2), 0.0   ;;  %v1236_v3 = vld [vmem:[%s1550_s1 + $0x2c] sm:$0xff] (!%p188_p2)   ;;  %v1238_v6 = vld [vmem:[%s1550_s1 + $0x34] sm:$0xff] (!%p188_p2)   ;;  %vm1285_vm0 = vmmov (!%p188_p2), 0  }
   0x6   : > { %191 = sbr.rel (%p188_p2) target bundleno = 784 (0x310), region = 40  ;;  %1174 = vmatprep.subr.bf16.mxu0 (!%p188_p2), %v1284_v1  ;;  %520 = vst [vmem:[#allocation3] sm:$0xff] (!%p188_p2), %v1284_v1  ;;  %523 = vst [vmem:[#allocation3 + $0x10] sm:$0xff] (!%p188_p2), %v1284_v1  ;;  %1188 = vmatprep.subr.bf16.mxu1 (!%p188_p2), %v1284_v1  ;;  %v1235_v2 = vld [vmem:[%s1550_s1] sm:$0xff] (!%p188_p2)   ;;  %v1237_v4 = vld [vmem:[%s1550_s1 + $0x8] sm:$0xff] (!%p188_p2)   ;;  %vm226_vm1 = vcmask (!%p188_p2), 588800  }
   0x7   : > { %525 = vst [vmem:[#allocation3 + $0x20] sm:$0x3] (!%p188_p2), %v1284_v1  ;;  %1175 = vmatpush3.bf16.msra.mxu0 (!%p188_p2), %v1234_v0  ;;  %1189 = vmatpush3.bf16.msra.mxu1 (!%p188_p2), %v1235_v2  ;;  %vm229_vm2 = vcmask (!%p188_p2), 582656   ;;  %227 = vst.msk [vmem:[#allocation2] sm:$0xff] (!%p188_p2), %vm226_vm1, %v1284_v1  ;;  %v1239_v9 = vld [vmem:[%s1550_s1 + $0x10] sm:$0xff] (!%p188_p2)   ;;  %vm301_vm3 = vcmask (!%p188_p2), 1043456  }
   0x8   : > { %1176 = vmatprep.subr.bf16.mxu0 (!%p188_p2), %v1284_v1  ;;  %1190 = vmatprep.subr.bf16.mxu1 (!%p188_p2), %v1284_v1  ;;  %228 = vst.msk [vmem:[#allocation2 + $0x8] sm:$0xff] (!%p188_p2), %vm226_vm1, %v1284_v1  ;;  %v1242_v11 = vld [vmem:[%s1550_s1 + $0x44] ss:$0 sps:$4 sm:$0xff] (!%p188_p2)   ;;  %v1240_v12 = vld [vmem:[%s1550_s1 + $0x3c] sm:$0xff] (!%p188_p2)   ;;  %s1286_s15 = smov (!%p188_p2), 4   ;;  %vm243_vm4 = vcmask (!%p188_p2), 556064  }
   0x9   : > { %1184 = vmatprep.mubr.msk.bf16.mxu0 (!%p188_p2), %vm1285_vm0, %v1284_v1  ;;  %1198 = vmatprep.mubr.msk.bf16.mxu1 (!%p188_p2), %vm1285_vm0, %v1284_v1  ;;  %230 = vst.msk [vmem:[#allocation2 + $0x10] sm:$0x3] (!%p188_p2), %vm229_vm2, %v1284_v1  ;;  %v1243_v13 = vld [vmem:[%s1550_s1 + $0x20] ss:$0 sps:$4 sm:$0xff] (!%p188_p2)   ;;  %v1241_v14 = vld [vmem:[%s1550_s1 + $0x18] sm:$0xff] (!%p188_p2)   ;;  %v303_v15 = vsel (!%p188_p2), %vm301_vm3, %v1242_v11, 0 }
   0xa   : > { %v377_v16 = vsel (!%p188_p2), %vm301_vm3, %v1243_v13, 0  ;;  %v1244_v20 = vld [vmem:[%s1550_s1 + $0x48] sm:$0xff] (!%p188_p2)   ;;  %v1245_v27 = vld [vmem:[%s1550_s1 + $0x50] sm:$0xff] (!%p188_p2)   ;;  %v1246_v28 = vld [vmem:[%s1550_s1 + $0x58] sm:$0xff] (!%p188_p2)   ;;  %vm521_vm5 = vcmask (!%p188_p2), 130048   ;;  %v1287_v37 = vmov (!%p188_p2), 0  }
   0xb   : > { %1177 = vmatpush3.bf16.msra.mxu0 (!%p188_p2), %v1236_v3  ;;  %1191 = vmatpush3.bf16.msra.mxu1 (!%p188_p2), %v1237_v4  ;;  %v1247_v29 = vld [vmem:[%s1550_s1 + $0x60] sm:$0xff] (!%p188_p2)   ;;  %v1248_v30 = vld [vmem:[%s1550_s1 + $0x68] ss:$0 sps:$4 sm:$0xff] (!%p188_p2)   ;;  %522 = vst.msk [vmem:[#allocation3 + $0x8] sm:$0xff] (!%p188_p2), %vm521_vm5, %v1284_v1  ;;  %524 = vst.msk [vmem:[#allocation3 + $0x18] sm:$0xff] (!%p188_p2), %vm521_vm5, %v1284_v1  ;;  %vm526_vm6 = vcmask (!%p188_p2), 123904  }
   0xc   : > { %1178 = vmatprep.subr.bf16.mxu0 (!%p188_p2), %v1284_v1  ;;  %1192 = vmatprep.subr.bf16.mxu1 (!%p188_p2), %v1284_v1  ;;  %v464_v31 = vsel (!%p188_p2), %vm301_vm3, %v1248_v30, 0  ;;  %v1249_v35 = vld [vmem:[%s1552_s3] sm:$0xff] (!%p188_p2)   ;;  %v1251_v36 = vld [vmem:[%s1552_s3 + $0x48] sm:$0xff] (!%p188_p2)   ;;  %v1253_v39 = vld [vmem:[%s1552_s3 + $0x50] sm:$0xff] (!%p188_p2)   ;;  %527 = vst.msk [vmem:[#allocation3 + $0x28] sm:$0x3] (!%p188_p2), %vm526_vm6, %v1284_v1 }
   0xd   : > { %s1556_s19 = smov (!%p215_p3, %s1035_s19), 1  ;;  %v1250_v38 = vld [vmem:[%s1552_s3 + $0x8] sm:$0xff]   ;;  %v1252_v40 = vld [vmem:[%s1552_s3 + $0x10] sm:$0xff]   ;;  %v1255_v41 = vld [vmem:[%s1552_s3 + $0x58] sm:$0xff]   ;;  %vm530_vm7 = vcmask 1040384   ;;  %s1288_s20 = smov 8  }
   0xe   : > { %s1150_s26 = sshll.u32 %s1556_s19, 3  ;;  %v1254_v42 = vld [vmem:[%s1552_s3 + $0x18] sm:$0xff]   ;;  %v1257_v43 = vld [vmem:[%s1552_s3 + $0x60] sm:$0xff]   ;;  %v1258_v45 = vld [vmem:[%s1552_s3 + $0x28] sm:$0xff]   ;;  %vm543_vm8 = vcmask 1047617   ;;  %vm545_vm9 = vcmask 64513  }
   0xf   : > { %s219_s6 = scalar_lea.vmem %s1549_s0, %s1150_s26  ;;  %1179 = vmatpush3.bf16.msra.mxu0 %v1238_v6  ;;  %1193 = vmatpush3.bf16.msra.mxu1 %v1239_v9  ;;  %v1256_v44 = vld [vmem:[%s1552_s3 + $0x20] sm:$0xff]   ;;  %v1259_v56 = vld [vmem:[%s1552_s3 + $0x68] sm:$0xff]   ;;  %v1260_v57 = vld [vmem:[%s1552_s3 + $0x30] sm:$0xff]   ;;  %vm547_vm10 = vcmask 1047616   ;;  %vm549_vm11 = vcmask 64512   ;;  %vm551_vm12 = vcmask 1040448  }
  0x10   : > { %v1153_v5 = vld [vmem:[%s219_s6] sm:$0xff]   ;;  %1180 = vmatprep.subr.bf16.mxu0 %v1284_v1  ;;  %1194 = vmatprep.subr.bf16.mxu1 %v1284_v1  ;;  %v1261_v62 = vld [vmem:[%s1552_s3 + $0x70] sm:$0xff]   ;;  %v1262_v63 = vld [vmem:[%s1552_s3 + $0x38] sm:$0xff]   ;;  %vm553_vm13 = vcmask 57344   ;;  %vm606_vm14 = vsmask.f32 7424 }
  0x11   : > { %v1154_v7 = vunpack.c.l.bf16 %v1153_v5  ;;  %v1155_v8 = vunpack.c.h.bf16 %v1153_v5  ;;  %v1080_v59 = vld [vmem:[%s1551_s2] ss:$0 sm:$0xff]  ;;  %v1266_v13 = vld [vmem:[%s1552_s3 + $0x88] sm:$0xff]   ;;  %vm859_vm15 = vcmask 1046528   ;;  %s1151_s22 = sshll.u32 %s1556_s19, 4 }
  0x12   : > { %v1264_v5 = vld [vmem:[%s1552_s3 + $0x40] sm:$0xff]   ;;  %s224_s25 = scalar_lea.vmem %s1554_s5, %s1151_s22 }
  0x13   : > { %v1229_v10 = vpack.i.bf16 %v1155_v8, %v1154_v7  ;;  %1181 = vmatpush3.bf16.msra.mxu0 %v1240_v12  ;;  %1195 = vmatpush3.bf16.msra.mxu1 %v1241_v14  ;;  %v1265_v11 = vld [vmem:[%s1552_s3 + $0x80] sm:$0xff]  }
  0x14   : > { %1182 = vmatprep.subr.bf16.mxu0 %v1284_v1  ;;  %1196 = vmatprep.subr.bf16.mxu1 %v1284_v1 }
  0x15   : > { %1230 = vrot.lane.b32.xlu0 %v1229_v10, %s1286_s15 }
  0x17   : > { %1183 = vmatpush3.bf16.msra.mxu0 %v303_v15  ;;  %1197 = vmatpush3.bf16.msra.mxu1 %v377_v16 }
  0x18   : > { %1202 = vmatprep.subr.bf16.mxu0 %v1284_v1  ;;  %689 = vmatprep.subr.bf16.mxu1 %v1287_v37 }
  0x87   : > { %v1231_v17 = vpop.permute.xlu0 %1230 }
  0x88   : > { %v1233_v18 = vunpack.i.h.bf16 %v1231_v17  ;;  %v1232_v19 = vunpack.i.l.bf16 %v1231_v17 }
  0x8a   : > { %244 = vst.msk [vmem:[#allocation2 + $0x1] sm:$0xff] %vm243_vm4, %v1232_v19  ;;  %245 = vst.msk [vmem:[#allocation2 + $0x9] sm:$0xff] %vm243_vm4, %v1233_v18 }
  0x91   : > { %v258_v21 = vld [vmem:[#allocation2 + $0x1] sm:$0xff]  ;;  %v259_v22 = vld [vmem:[#allocation2 + $0x9] sm:$0xff] }
  0x92   : > { %v246_v23 = vld [vmem:[#allocation2] sm:$0xff]  ;;  %v260_v24 = vpack.c.bf16 %v259_v22, %v258_v21  ;;  %v247_v25 = vld [vmem:[#allocation2 + $0x8] sm:$0xff] }
  0x93   : > { %v248_v26 = vpack.c.bf16 %v247_v25, %v246_v23  ;;  %v420_v32 = vld [vmem:[#allocation2 + $0x2] sm:$0xff]  ;;  %v421_v33 = vld [vmem:[#allocation2 + $0xa] sm:$0xff] }
  0x94   : > { %1185 = vmatmul.mubr.msk.bf16.vlgmr.msra.gmra.mrb[0].mxu0 %vm226_vm1, %v260_v24  ;;  %v422_v34 = vpack.c.bf16 %v421_v33, %v420_v32 }
  0x95   : > { %1199 = vmatmul.mubr.msk.bf16.vlgmr.msra.gmra.mrb[0].mxu1 %vm226_vm1, %v248_v26  ;;  %1203 = vmatpush3.bf16.msra.mxu0 %v1244_v20 }
  0x96   : > { %1204 = vmatprep.subr.bf16.mxu0 %v1284_v1  ;;  %1212 = vmatprep.mubr.msk.bf16.mxu0 %vm1285_vm0, %v1284_v1 }
  0x97   : > { %690 = vmatpush1.bf16.msra.mxu1 %v1251_v36 }
  0x98   : > { %691 = vmatprep.subr.bf16.mxu1 %v1287_v37 }
  0x99   : > { %1205 = vmatpush3.bf16.msra.mxu0 %v1245_v27 }
  0x9a   : > { %1206 = vmatprep.subr.bf16.mxu0 %v1284_v1 }
  0x9b   : > { %692 = vmatpush1.bf16.msra.mxu1 %v1253_v39 }
  0x9c   : > { %693 = vmatprep.subr.bf16.mxu1 %v1287_v37 }
  0x9d   : > { %1207 = vmatpush3.bf16.msra.mxu0 %v1246_v28 }
  0x9e   : > { %1208 = vmatprep.subr.bf16.mxu0 %v1284_v1 }
  0x9f   : > { %694 = vmatpush1.bf16.msra.mxu1 %v1255_v41 }
  0xa0   : > { %695 = vmatprep.subr.bf16.mxu1 %v1287_v37 }
  0xa1   : > { %1209 = vmatpush3.bf16.msra.mxu0 %v1247_v29 }
  0xa2   : > { %1210 = vmatprep.subr.bf16.mxu0 %v1284_v1  ;;  %v1263_v1 = vld [vmem:[%s1552_s3 + $0x78] sm:$0xff]  }
  0xa3   : > { %696 = vmatpush1.bf16.msra.mxu1 %v1257_v43 }
  0xa4   : > { %697 = vmatprep.subr.bf16.mxu1 %v1287_v37 }
  0xa5   : > { %1211 = vmatpush3.bf16.msra.mxu0 %v464_v31 }
  0xa6   : > { %787 = vmatprep.subr.bf16.mxu0 %v1287_v37 }
  0xa7   : > { %698 = vmatpush1.bf16.msra.mxu1 %v1259_v56  ;;  %v1270_v56 = vld [vmem:[%s1552_s3 + $0xa8] sm:$0xff]  }
  0xa8   : > { %1213 = vmatmul.mubr.msk.bf16.vlgmr.msra.gmra.mrb[4].mxu0 %vm226_vm1, %v422_v34  ;;  %699 = vmatprep.subr.bf16.mxu1 %v1287_v37 }
  0xa9   : > { %788 = vmatpush1.bf16.msra.mxu0 %v1249_v35 }
  0xaa   : > { %789 = vmatprep.subr.bf16.mxu0 %v1287_v37 }
  0xab   : > { %700 = vmatpush1.bf16.msra.mxu1 %v1261_v62 }
  0xac   : > { %701 = vmatprep.subr.bf16.mxu1 %v1287_v37 }
  0xad   : > { %790 = vmatpush1.bf16.msra.mxu0 %v1250_v38 }
  0xae   : > { %791 = vmatprep.subr.bf16.mxu0 %v1287_v37 }
  0xaf   : > { %702 = vmatpush1.bf16.msra.mxu1 %v1263_v1 }
  0xb0   : > { %703 = vmatprep.subr.bf16.mxu1 %v1287_v37 }
  0xb1   : > { %792 = vmatpush1.bf16.msra.mxu0 %v1252_v40 }
  0xb2   : > { %793 = vmatprep.subr.bf16.mxu0 %v1287_v37 }
  0xb3   : > { %704 = vmatpush1.bf16.msra.mxu1 %v1265_v11 }
  0xb4   : > { %705 = vmatprep.subr.bf16.mxu1 %v1287_v37 }
  0xb5   : > { %794 = vmatpush1.bf16.msra.mxu0 %v1254_v42 }
  0xb6   : > { %795 = vmatprep.subr.bf16.mxu0 %v1287_v37 }
  0xb7   : > { %706 = vmatpush1.bf16.msra.mxu1 %v1266_v13 }
  0xb8   : > { %924 = vmatprep.subr.bf16.mxu1 %v1287_v37 }
  0xb9   : > { %796 = vmatpush1.bf16.msra.mxu0 %v1256_v44 }
  0xba   : > { %797 = vmatprep.subr.bf16.mxu0 %v1287_v37 }
  0xbd   : > { %798 = vmatpush1.bf16.msra.mxu0 %v1258_v45 }
  0xbe   : > { %799 = vmatprep.subr.bf16.mxu0 %v1287_v37 }
  0xc1   : > { %800 = vmatpush1.bf16.msra.mxu0 %v1260_v57  ;;  %v1271_v57 = vld [vmem:[%s1552_s3 + $0xb0] sm:$0xff]  }
  0xc2   : > { %801 = vmatprep.subr.bf16.mxu0 %v1287_v37 }
  0xc5   : > { %802 = vmatpush1.bf16.msra.mxu0 %v1262_v63 }
  0xc6   : > { %803 = vmatprep.subr.bf16.mxu0 %v1287_v37 }
  0xc9   : > { %804 = vmatpush1.bf16.msra.mxu0 %v1264_v5 }
 0x167   : > { %v339_v46 = vpop.f32.mrb[0].mxu0 }
 0x168   : > { %v413_v47 = vpop.f32.mrb[0].mxu1  ;;  %v1186_v48 = vpop.f32.mrb[1].mxu0 }
 0x169   : > { %v414_v49 = vadd.f32 %v413_v47, %v339_v46  ;;  %v1200_v50 = vpop.f32.mrb[1].mxu1  ;;  %v342_v51 = vpop.f32.mrb[2].mxu0 }
 0x16a   : > { %v416_v52 = vpop.f32.mrb[2].mxu1  ;;  %v1187_v53 = vpop.f32.mrb[3].mxu0 }
 0x16b   : > { %v417_v54 = vadd.f32 %v416_v52, %v342_v51  ;;  %v1201_v55 = vpop.f32.mrb[3].mxu1 }
 0x16c   : > { %v1269_v55 = vld [vmem:[%s1552_s3 + $0xa0] sm:$0xff]  }
 0x17b   : > { %v500_v58 = vpop.f32.mrb[4].mxu0 }
 0x17c   : > { %v507_v60 = vadd.f32 %v500_v58, %v414_v49  ;;  %v1214_v61 = vpop.f32.mrb[5].mxu0  ;;  %v1267_v49 = vld [vmem:[%s1552_s3 + $0x90] sm:$0xff]   ;;  %v1272_v58 = vld [vmem:[%s1552_s3 + $0xb8] sm:$0xff]  }
 0x17d   : > { %v503_v0 = vpop.f32.mrb[6].mxu0  ;;  %v1274_v61 = vld [vmem:[%s1552_s3 + $0xc8] sm:$0xff]  }
 0x17e   : > { %v516_v2 = vadd.f32 %v1080_v59, %v507_v60  ;;  %v508_v3 = vadd.f32 %v503_v0, %v417_v54  ;;  %v1215_v4 = vpop.f32.mrb[7].mxu0  ;;  %v1268_v54 = vld [vmem:[%s1552_s3 + $0x98] sm:$0xff]   ;;  %v1275_v0 = vld [vmem:[%s1552_s3 + $0xd0] sm:$0xff]  }
 0x180   : > { %v518_v6 = vmax.f32 %v516_v2, 0.0  ;;  %v517_v7 = vadd.f32 %v1080_v59, %v508_v3  ;;  %v1273_v59 = vld [vmem:[%s1552_s3 + $0xc0] sm:$0xff]  }
 0x182   : > { %v531_v8 = vrot.slane %v518_v6, 7  ;;  %v519_v9 = vmax.f32 %v517_v7, 0.0 }
 0x184   : > { %v532_v10 = vrot.slane %v519_v9, 7  ;;  %534 = vrot.lane.b32.xlu0 %v531_v8, %s1288_s20 }
 0x186   : > { %v533_v12 = vsel %vm530_vm7, %v531_v8, %v532_v10 }
 0x187   : > { %536 = vrot.lane.b32.xlu1 %v533_v12, %s1288_s20 }
 0x18b   : > { %538 = vrot.lane.b32.xlu1 %v532_v10, %s1288_s20 }
 0x1f6   : > { %v535_v14 = vpop.permute.xlu0 %534 }
 0x1f7   : > { %544 = vst.msk [vmem:[#allocation3] sm:$0xfe] %vm543_vm8, %v535_v14 }
 0x1f8   : > { %546 = vst.msk [vmem:[#allocation3 + $0x8] sm:$0xfe] %vm545_vm9, %v535_v14 }
 0x1f9   : > { %v537_v15 = vpop.permute.xlu1 %536 }
 0x1fa   : > { %548 = vst.msk [vmem:[#allocation3 + $0x10] sm:$0xff] %vm547_vm10, %v537_v15 }
 0x1fb   : > { %550 = vst.msk [vmem:[#allocation3 + $0x18] sm:$0xff] %vm549_vm11, %v537_v15 }
 0x1fd   : > { %v539_v16 = vpop.permute.xlu1 %538 }
 0x1fe   : > { %552 = vst.msk [vmem:[#allocation3 + $0x20] sm:$0x1] %vm551_vm12, %v539_v16  ;;  %v555_v18 = vld [vmem:[#allocation3] sm:$0xff] }
 0x1ff   : > { %554 = vst.msk [vmem:[#allocation3 + $0x28] sm:$0x1] %vm553_vm13, %v539_v16  ;;  %v556_v17 = vld [vmem:[#allocation3 + $0x8] sm:$0xff]  ;;  %v579_v22 = vld [vmem:[#allocation3] sm:$0xfe] }
 0x200   : > { %v580_v19 = vld [vmem:[#allocation3 + $0x8] sm:$0xfe]  ;;  %v828_v63 = vld [vmem:[#allocation3] sm:$0xfc] }
 0x201   : > { %v1494_v21 = vld [vmem:[#allocation3 + $0x10] sm:$0xff]  ;;  %v829_v38 = vld [vmem:[#allocation3 + $0x8] sm:$0xfc] }
 0x202   : > { %v558_v20 = vld [vmem:[#allocation3 + $0x18] sm:$0xff]  ;;  %v559_v24 = vpack.c.bf16 %v1494_v21, %v555_v18  ;;  %v583_v26 = vpack.c.bf16 %v1494_v21, %v579_v22  ;;  %v832_v2 = vpack.c.bf16 %v1494_v21, %v828_v63 }
 0x203   : > { %v560_v23 = vpack.c.bf16 %v558_v20, %v556_v17  ;;  %v584_v25 = vpack.c.bf16 %v558_v20, %v580_v19  ;;  %v833_v43 = vpack.c.bf16 %v558_v20, %v829_v38 }
 0x204   : > { %v610_v28 = vshll.u32 %v583_v26, 16  ;;  %v608_v41 = vshrl.u32 %v583_v26, 16  ;;  %v860_v4 = vrot.slane %v832_v2, 1 }
 0x205   : > { %1118 = vmatprep.mubr.msk.bf16.mxu0 %vm521_vm5, %v560_v23  ;;  %v622_v27 = vshll.u32 %v584_v25, 16  ;;  %v581_v30 = vld [vmem:[#allocation3 + $0x20] sm:$0x1]  ;;  %v620_v36 = vshrl.u32 %v584_v25, 16  ;;  %v863_v52 = vrot.slane %v833_v43, 1 }
 0x206   : > { %820 = vmatmul.mubr.bf16.vlgmr.msra.gmra.mrb[8].mxu0 %v559_v24  ;;  %v582_v29 = vld [vmem:[#allocation3 + $0x28] sm:$0x1]  ;;  %v585_v34 = vpack.c.bf16 %v581_v30, %v581_v30  ;;  %v612_v35 = vrot.slane %v610_v28, 1  ;;  %v830_v60 = vld [vmem:[#allocation3 + $0x20] sm:$0x3] }
 0x207   : > { %v831_v31 = vld [vmem:[#allocation3 + $0x28] sm:$0x3]  ;;  %v586_v32 = vpack.c.bf16 %v582_v29, %v582_v29  ;;  %v624_v33 = vrot.slane %v622_v27, 1  ;;  %v834_v62 = vpack.c.bf16 %v830_v60, %v830_v60 }
 0x208   : > { %v835_v39 = vpack.c.bf16 %v831_v31, %v831_v31  ;;  %v615_v42 = vshll.u32 %v585_v34, 16  ;;  %v613_v46 = vor.u32 %v612_v35, %v608_v41 }
 0x209   : > { %v627_v40 = vshll.u32 %v586_v32, 16  ;;  %v625_v44 = vor.u32 %v624_v33, %v620_v36  ;;  %v861_v3 = vrot.slane %v834_v62, 1 }
 0x20a   : > { %v617_v47 = vrot.slane %v615_v42, 1  ;;  %v864_v48 = vrot.slane %v835_v39, 1 }
 0x20b   : > { %v629_v45 = vrot.slane %v627_v40, 1  ;;  %v862_v1 = vsel %vm859_vm15, %v860_v4, %v861_v3 }
 0x20c   : > { %v618_v51 = vsel %vm606_vm14, %v613_v46, %v617_v47  ;;  %v865_v53 = vsel %vm859_vm15, %v863_v52, %v864_v48 }
 0x20d   : > { %v630_v50 = vsel %vm606_vm14, %v625_v44, %v629_v45 }
 0x20e   : > { %1108 = vmatprep.mubr.msk.bf16.mxu1 %vm521_vm5, %v630_v50 }
 0x20f   : > { %722 = vmatmul.mubr.bf16.vlgmr.msra.gmra.mrb[4].mxu1 %v618_v51 }
 0x210   : > { %925 = vmatpush1.bf16.msra.mxu1 %v1267_v49  ;;  %1146 = vmatprep.mubr.msk.bf16.mxu1 %vm521_vm5, %v865_v53 }
 0x211   : > { %926 = vmatprep.subr.bf16.mxu1 %v1287_v37 }
 0x214   : > { %927 = vmatpush1.bf16.msra.mxu1 %v1268_v54 }
 0x215   : > { %928 = vmatprep.subr.bf16.mxu1 %v1287_v37 }
 0x218   : > { %929 = vmatpush1.bf16.msra.mxu1 %v1269_v55 }
 0x219   : > { %930 = vmatprep.subr.bf16.mxu1 %v1287_v37 }
 0x21c   : > { %931 = vmatpush1.bf16.msra.mxu1 %v1270_v56 }
 0x21d   : > { %932 = vmatprep.subr.bf16.mxu1 %v1287_v37 }
 0x220   : > { %933 = vmatpush1.bf16.msra.mxu1 %v1271_v57 }
 0x221   : > { %934 = vmatprep.subr.bf16.mxu1 %v1287_v37 }
 0x224   : > { %935 = vmatpush1.bf16.msra.mxu1 %v1272_v58 }
 0x225   : > { %936 = vmatprep.subr.bf16.mxu1 %v1287_v37 }
 0x228   : > { %937 = vmatpush1.bf16.msra.mxu1 %v1273_v59 }
 0x229   : > { %938 = vmatprep.subr.bf16.mxu1 %v1287_v37 }
 0x22c   : > { %939 = vmatpush1.bf16.msra.mxu1 %v1274_v61 }
 0x22d   : > { %940 = vmatprep.subr.bf16.mxu1 %v1287_v37  ;;  %v1147_v37 = vld [vmem:[%s1553_s4] ss:$0 sm:$0xff] }
 0x230   : > { %941 = vmatpush1.bf16.msra.mxu1 %v1275_v0 }
 0x233   : > { %957 = vmatmul.mubr.bf16.vlgmr.msra.gmra.mrb[8].mxu1 %v862_v1 }
 0x2d9   : > { %v821_v5 = vpop.f32.mrb[8].mxu0 }
 0x2da   : > { %v823_v6 = vpop.f32.mrb[9].mxu0 }
 0x2db   : > { %v824_v7 = vpop.f32.mrb[10].mxu0 }
 0x2dc   : > { %v826_v8 = vpop.f32.mrb[11].mxu0 }
 0x2e2   : > { %v723_v9 = vpop.f32.mrb[4].mxu1 }
 0x2e3   : > { %v822_v10 = vadd.f32 %v821_v5, %v723_v9  ;;  %v725_v11 = vpop.f32.mrb[5].mxu1 }
 0x2e4   : > { %v726_v12 = vpop.f32.mrb[6].mxu1 }
 0x2e5   : > { %v825_v13 = vadd.f32 %v824_v7, %v726_v12  ;;  %v728_v14 = vpop.f32.mrb[7].mxu1 }
 0x306   : > { %v958_v15 = vpop.f32.mrb[8].mxu1 }
 0x307   : > { %v965_v16 = vadd.f32 %v958_v15, %v822_v10  ;;  %v960_v17 = vpop.f32.mrb[9].mxu1 }
 0x308   : > { %v961_v18 = vpop.f32.mrb[10].mxu1 }
 0x309   : > { %v974_v19 = vadd.f32 %v1147_v37, %v965_v16  ;;  %v966_v20 = vadd.f32 %v961_v18, %v825_v13  ;;  %v963_v21 = vpop.f32.mrb[11].mxu1 }
 0x30b   : > { %v976_v22 = vmax.f32 %v974_v19, 0.0  ;;  %v975_v23 = vadd.f32 %v1147_v37, %v966_v20 }
 0x30d   : > { %978 = vst [vmem:[%s224_s25] sm:$0xff] %v976_v22  ;;  %v977_v24 = vmax.f32 %v975_v23, 0.0 }
 0x30f   : > { %979 = vst [vmem:[%s224_s25 + $0x8] sm:$0xff] %v977_v24 }
 0x310 PF: > { %s15_s18 = sadd.s32 1, %s1282_s18  }
 0x311   : > { %p12_p4 = scmp.ge.s32.totalorder %s15_s18, 4  }
 0x313   :  { %14 = sbr.rel (!%p12_p4) target bundleno = 1 (0x1), region = 74 }

</bundles_post_ra>
